<compile_context>
chip_gen: v5e
topology: v5e:2x2
jax: 0.10.0
libtpu: 0.0.40
codegen_flags: <defaults>
</compile_context>

<pallas_src>
import jax
import jax.numpy as jnp
from jax.experimental import pallas as pl
from jax.experimental.pallas import tpu as pltpu


def _sa_kernel(g_ref, x_ref, o_ref):
    """One (1, C, T) tile: out = relu((g+x) * sigmoid(sum_c(g+x)))."""
    gx = g_ref[...] + x_ref[...]                                   # (1, C, T)
    s = jnp.sum(gx, axis=1, keepdims=True, dtype=jnp.float32)      # (1, 1, T)
    scale = jax.nn.sigmoid(s).astype(gx.dtype)                     # (1, 1, T)
    o_ref[...] = jnp.maximum(gx * scale, 0.0).astype(o_ref.dtype)


def _round_up(x, m):
    return ((x + m - 1) // m) * m


def _vmem_budget_bytes():
    """Per-step budget for the double-buffered (g, x, out) working set."""
    try:
        info = pltpu.get_tpu_info()
        cap = getattr(info, "vmem_capacity_bytes", None)
        if cap:
            # Bigger tiles amortize the ~0.35us/step overhead (matters most on
            # v7x's fast HBM) while staying well under physical VMEM
            # (64 MiB/TC on v7x, 128 MiB on v5e/v6e).
            return int(min(24 * 1024 * 1024, cap // 2))
    except Exception:
        pass
    return 12 * 1024 * 1024


def _pick_spatial_tile(hw, c, itemsize, budget_bytes, batch, min_grid_steps=4):
    """Lane-dense spatial tile (multiple of 128, or full HW when HW <= 128)
    sized so the double-buffered (g, x, out) blocks fit `budget_bytes`, while
    keeping at least `min_grid_steps` total grid steps when possible."""
    if hw <= 128:
        return hw                         # full extent (legal non-128 block)
    bytes_per_lane = 6 * c * itemsize     # 3 arrays x 2 pipeline buffers
    t = max(128, (budget_bytes // bytes_per_lane) // 128 * 128)
    t = min(t, _round_up(hw, 128))        # never larger than the padded extent
    tiles_needed = -(-min_grid_steps // max(batch, 1))           # ceil
    if tiles_needed > 1:
        t = min(t, max(128, _round_up(-(-hw // tiles_needed), 128)))
    return t


def _make_spec(c, thw, n_buffers):
    index_map = lambda b, t: (b, 0, t)
    if n_buffers > 2:
        try:   # pipeline_mode is a newer BlockSpec option; fall back cleanly.
            return pl.BlockSpec((1, c, thw), index_map,
                                pipeline_mode=pl.Buffered(n_buffers))
        except Exception:
            pass
    return pl.BlockSpec((1, c, thw), index_map)


def spatial_attention(g_nchw, x_nchw):
    """Pallas-backed SA forward. g, x: (B, C, H, W) with identical shapes."""
    if g_nchw.shape != x_nchw.shape:
        raise ValueError("SA requires g and x to have identical shapes")
    B, C, H, W = g_nchw.shape
    HW = H * W
    itemsize = jnp.dtype(g_nchw.dtype).itemsize

    # Pure reshapes (no data movement): lane axis = flattened spatial.
    g = g_nchw.reshape(B, C, HW)
    x = x_nchw.reshape(B, C, HW)

    thw = _pick_spatial_tile(HW, C, itemsize, _vmem_budget_bytes(), B)
    grid = (B, pl.cdiv(HW, thw))

    block_bytes = C * thw * itemsize
    n_buffers = 3 if block_bytes < 128 * 1024 else 2   # extra depth only for tiny blocks
    spec = _make_spec(C, thw, n_buffers)

    # Explicit scoped-VMEM limit covering the pipelined blocks + headroom,
    # independent of the 16/32 MiB per-generation defaults.
    vmem_limit = int(min(max(3 * n_buffers * block_bytes + 4 * 1024 * 1024,
                             16 * 1024 * 1024),
                         60 * 1024 * 1024))

    cost = pl.CostEstimate(
        flops=4 * B * C * HW,            # add, reduce-add, mul, max per element
        transcendentals=B * HW,          # one sigmoid per pixel
        bytes_accessed=3 * B * C * HW * itemsize,
    )

    out = pl.pallas_call(
        _sa_kernel,
        out_shape=jax.ShapeDtypeStruct((B, C, HW), g_nchw.dtype),
        grid_spec=pltpu.PrefetchScalarGridSpec(
            num_scalar_prefetch=0,
            grid=grid,
            in_specs=[spec, spec],
            out_specs=spec,
        ),
        compiler_params=pltpu.CompilerParams(
            dimension_semantics=("parallel", "parallel"),
            vmem_limit_bytes=vmem_limit),
        cost_estimate=cost,
    )(g, x)

    return out.reshape(B, C, H, W)


def _sa_reference(g, x):
    """Pure-JAX reference mirroring the PyTorch forward exactly."""
    gs = jnp.sum(g, axis=1, keepdims=True)
    xs = jnp.sum(x, axis=1, keepdims=True)
    scale = jax.nn.sigmoid(gs + xs)
    return jnp.maximum(g * scale + x * scale, 0.0)


if __name__ == "__main__":
    key = jax.random.PRNGKey(0)
    kg, kx = jax.random.split(key)

    # SA's (unused) inconv implies 512 channels; keep spatial small.
    B, C, H, W = 2, 512, 16, 16
    g = jax.random.normal(kg, (B, C, H, W), jnp.float32)
    x = jax.random.normal(kx, (B, C, H, W), jnp.float32)

    out = jax.block_until_ready(spatial_attention(g, x))

    ref = _sa_reference(g, x)
    assert out.shape == ref.shape and out.dtype == ref.dtype
    max_err = float(jnp.max(jnp.abs(out - ref)))
    assert bool(jnp.allclose(out, ref, atol=1e-4, rtol=1e-4)), \
        f"mismatch vs reference, max abs err = {max_err}"

    print("KERNEL_OK")
</pallas_src>

<mosaic_0001>
module attributes {stable_mosaic.version = 11 : i64} {
  func.func @_sa_kernel(%arg0: i32, %arg1: i32, %arg2: memref<1x512x128xf32, #tpu.memory_space<vmem>>, %arg3: memref<1x512x128xf32, #tpu.memory_space<vmem>>, %arg4: memref<1x512x128xf32, #tpu.memory_space<vmem>>) attributes {dimension_semantics = [#tpu.dimension_semantics<parallel>, #tpu.dimension_semantics<parallel>], iteration_bounds = array<i64: 2, 2>, scalar_prefetch = 0 : i64, scratch_operands = 0 : i64, tpu.core_type = #tpu.core_type<tc>, window_params = [{transform_indices = @transform_0, window_bounds = array<i64: 1, 512, 128>}, {transform_indices = @transform_1, window_bounds = array<i64: 1, 512, 128>}, {transform_indices = @transform_2, window_bounds = array<i64: 1, 512, 128>}]} {
    %c0 = arith.constant 0 : index
    %c0_0 = arith.constant 0 : index
    %c0_1 = arith.constant 0 : index
    %0 = vector.load %arg2[%c0, %c0_0, %c0_1] : memref<1x512x128xf32, #tpu.memory_space<vmem>>, vector<1x512x128xf32>
    %c0_2 = arith.constant 0 : index
    %c0_3 = arith.constant 0 : index
    %c0_4 = arith.constant 0 : index
    %1 = vector.load %arg3[%c0_2, %c0_3, %c0_4] : memref<1x512x128xf32, #tpu.memory_space<vmem>>, vector<1x512x128xf32>
    %2 = arith.addf %0, %1 : vector<1x512x128xf32>
    %cst = arith.constant dense<0.000000e+00> : vector<1x128xf32>
    %3 = vector.multi_reduction <add>, %2, %cst [1] : vector<1x512x128xf32> to vector<1x128xf32>
    %4 = vector.shape_cast %3 : vector<1x128xf32> to vector<1x1x128xf32>
    %5 = arith.negf %4 : vector<1x1x128xf32>
    %6 = math.exp %5 : vector<1x1x128xf32>
    %cst_5 = arith.constant 1.000000e+00 : f32
    %7 = vector.broadcast %cst_5 : f32 to vector<1x1x128xf32>
    %8 = arith.addf %7, %6 : vector<1x1x128xf32>
    %9 = arith.divf %7, %8 : vector<1x1x128xf32>
    %10 = vector.broadcast %9 : vector<1x1x128xf32> to vector<1x512x128xf32>
    %11 = arith.mulf %2, %10 : vector<1x512x128xf32>
    %cst_6 = arith.constant 0.000000e+00 : f32
    %12 = vector.broadcast %cst_6 : f32 to vector<1x512x128xf32>
    %13 = arith.maximumf %11, %12 : vector<1x512x128xf32>
    %c0_7 = arith.constant 0 : index
    %c0_8 = arith.constant 0 : index
    %c0_9 = arith.constant 0 : index
    %14 = vector.load %arg4[%c0_7, %c0_8, %c0_9] : memref<1x512x128xf32, #tpu.memory_space<vmem>>, vector<1x512x128xf32>
    tpu.vector_store %arg4[%c0_7, %c0_8, %c0_9], %13 {strides = array<i32>} : memref<1x512x128xf32, #tpu.memory_space<vmem>>, vector<1x512x128xf32>,
    return
  }
  func.func @transform_0(%arg0: i32, %arg1: i32) -> (i32, i32, i32) {
    %c0_i32 = arith.constant 0 : i32
    %c0_i32_0 = arith.constant 0 : i32
    return %arg0, %c0_i32, %arg1 : i32, i32, i32
  }
  func.func @transform_1(%arg0: i32, %arg1: i32) -> (i32, i32, i32) {
    %c0_i32 = arith.constant 0 : i32
    %c0_i32_0 = arith.constant 0 : i32
    return %arg0, %c0_i32, %arg1 : i32, i32, i32
  }
  func.func @transform_2(%arg0: i32, %arg1: i32) -> (i32, i32, i32) {
    %c0_i32 = arith.constant 0 : i32
    %c0_i32_0 = arith.constant 0 : i32
    return %arg0, %c0_i32, %arg1 : i32, i32, i32
  }
}

</mosaic_0001>

<bundles_post_ra>
// kernel: tpu_custom_call.1
= control target key start
LH: loop header
LB: loop body
LE: loop exit
PB: predicated region body
PF: predicated region fallthrough
CT: control target
= control target key end

     0   :  { %s1815_s0 = inlined_call_operand.hbm [shape: f32[2,512,256], index: 0, kind: input, shape index: {}]   ;;  %s1816_s1 = inlined_call_operand.hbm [shape: f32[2,512,256], index: 1, kind: input, shape index: {}]   ;;  %s1817_s2 = inlined_call_operand.hbm [shape: f32[2,512,256], index: 2, kind: output, shape index: {}]  }
   0x1   :  { %1838 = sst [smem:[#allocation31_spill]] %s1815_s0 }
   0x2   :  { %7 = vsyncpa [#allocation3], 0 }
   0x3   :  { %9 = vsyncpa [#allocation3 + $0x1], 0 }
   0x4   :  { %10 = vsyncpa [#allocation6], 0 }
   0x5   :  { %12 = vsyncpa [#allocation6 + $0x1], 0 }
   0x6   :  { %13 = vsyncpa [#allocation4], 0 }
   0x7   :  { %15 = vsyncpa [#allocation4 + $0x1], 0  ;;  %s1126_s9 = smov 0   ;;  %s1128_s10 = smov 0  }
   0x8   :  { %s1130_s11 = smov 0   ;;  %s1132_s12 = smov 0  }
   0x9   :  { %s1134_s13 = smov 0   ;;  %s1136_s14 = smov 0  }
   0xa   :  { %s1138_s15 = smov 0   ;;  %s1140_s16 = smov 0  }
   0xb LB: > { %1839 = sst [smem:[#allocation11_spill]] %s1099_s15  ;;  %s828_s17 = sadd.s32 4294967295, %s1103_s16   ;;  %s1103_s16 = sphi %s1140_s16, %s21_s16   ;;  %s1099_s15 = sphi %s1138_s15, %s1884_s15   ;;  %s1095_s14 = sphi %s1136_s14, %s1889_s14   ;;  %s1091_s13 = sphi %s1134_s13, %s1882_s13   ;;  %s1087_s12 = sphi %s1132_s12, %s1888_s12   ;;  %s1083_s11 = sphi %s1130_s11, %s1887_s11   ;;  %s1079_s10 = sphi %s1128_s10, %s1886_s10   ;;  %s1075_s9 = sphi %s1126_s9, %s1885_s9  }
   0xc   : > { %s829_s18 = sadd.s32 4294967294, %s1103_s16   ;;  %s30_s19 = sadd.s32 1, %s1095_s14 }
   0xd   : > { %s33_s20 = sadd.s32 1, %s1099_s15  ;;  %p31_p0 = scmp.ge.s32.totalorder %s30_s19, 2 }
   0xe   : > { %s42_s21 = sadd.s32 1, %s1083_s11  ;;  %p49_p1 = scmp.ne.s32.totalorder %s1083_s11, %s1079_s10 }
   0xf   : > { %p50_p2 = scmp.eq.s32.totalorder %s1103_s16, 0  ;;  %s1891_s19 = smov (%p31_p0, %s30_s19), 0 }
  0x10   : > { %1840 = sst [smem:[#allocation12_spill]] %s1891_s19  ;;  %s1893_s20 = smov (!%p31_p0, %s33_s20), %s1099_s15 }
  0x11   : > { %s38_s22 = ssub.s32 %s1095_s14, %s1891_s19  ;;  %p1179_p3 = por %p50_p2, %p49_p1 }
  0x12   : > { %p35_p4 = scmp.ge.s32.totalorder %s1893_s20, 2  ;;  %p55_p5 = scmp.ne.s32.totalorder %s1079_s10, %s1075_s9 }
  0x13   : > { %p56_p6 = scmp.eq.s32.totalorder %s828_s17, 0  ;;  %p109_p7 = scmp.eq.s32.totalorder %s828_s17, 3 }
  0x14   : > { %s1895_s20 = smov (%p35_p4, %s1893_s20), 0  ;;  %p115_p10 = scmp.eq.s32.totalorder %s829_s18, 3 }
  0x15   : > { %1842 = sst [smem:[#allocation13_spill]] %s1895_s20  ;;  %p1187_p8 = por %p56_p6, %p55_p5 }
  0x16   : > { %p1191_p9 = por %p109_p7, %p49_p1  ;;  %s37_s26 = ssub.s32 %s1099_s15, %s1895_s20 }
  0x17   : > { %s39_s27 = sor.u32 %s38_s22, %s37_s26  ;;  %p1197_p12 = por %p115_p10, %p55_p5 }
  0x18   : > { %p40_p11 = scmp.eq.s32.totalorder %s39_s27, 0  ;;  %p865_p13 = scmp.lt.s32.totalorder %s1103_s16, 4 }
  0x19   : > { %s1203_s29 = sand.u32 1, %s1083_s11   ;;  %s833_s4 = sshll.u32 %s1099_s15, 7 }
  0x1a   : > { %s1206_s30 = scalar_select %p40_p11, %s1083_s11, %s42_s21  }
  0x1b   : > { %s832_s3 = sshll.u32 %s1203_s29, 9  ;;  %s143_s5 = sadd.s32 %s1095_s14, %s833_s4 }
  0x1c   : > { %s139_s6 = scalar_lea.vmem [#allocation2], %s832_s3  ;;  %s834_s8 = sshll.u32 %s143_s5, 3 }
  0x1d   : > { %s148_s7 = sshll.u32 %s139_s6, 4  ;;  %s1846_s0 = sld [smem:[#allocation31_spill]]  ;;  %s149_s7 = int_to_ptr.vmem [resolvable:$true] %s148_s7 }
  0x1e   : > { %p1216_p0 = pnand %p865_p13, %p1179_p3  ;;  %s136_s27 = scalar_lea.sflag [#allocation3], %s1203_s29 }
  0x1f   : > { %s1105_s4 = smov 256   ;;  %s1106_s20 = smov 128  }
  0x20   : > { %s1107_s6 = smov 8   ;;  %p838_p1 = scmp.ge.s32.totalorder %s1103_s16, 1 }
  0x21   : > { %p179_p2 = scmp.lt.s32.totalorder %s1103_s16, 5  ;;  %s168_s17 = scalar_lea.hbm %s1816_s1, %s834_s8 }
  0x22   : > { %s169_s18 = sshll.u32 %s168_s17, 4  ;;  %s170_s18 = int_to_ptr.hbm [resolvable:$true] %s169_s18 }
  0x23   : > { %s145_s22 = scalar_lea.hbm %s1846_s0, %s834_s8  ;;  %p180_p4 = pnand %p838_p1, %p179_p2 }
  0x24   : > { %s146_s21 = sshll.u32 %s145_s22, 4  ;;  %s162_s0 = scalar_lea.vmem [#allocation5], %s832_s3  ;;  %s147_s21 = int_to_ptr.hbm [resolvable:$true] %s146_s21 }
  0x25   : > { %857 = dma.hbm_to_vmem [thread:$0]  (!%p1216_p0), %s147_s21, 8192, %s149_s7, %s136_s27, %s1105_s4, %s1106_s20, %s1107_s6  }
  0x26   : > { %s171_s19 = sshll.u32 %s162_s0, 4  ;;  %s159_s22 = scalar_lea.sflag [#allocation6], %s1203_s29  ;;  %s172_s19 = int_to_ptr.vmem [resolvable:$true] %s171_s19 }
  0x27   : > { %860 = dma.hbm_to_vmem [thread:$0]  (!%p1216_p0), %s170_s18, 8192, %s172_s19, %s159_s22, %s1105_s4, %s1106_s20, %s1107_s6  }
  0x28   : > { %183 = sbr.rel (%p180_p4) target bundleno = 294 (0x126), region = 28 }
  0x2d   : > { %s1232_s15 = sand.u32 1, %s1079_s10  }
  0x2e   : > { %s1235_s7 = sshll.u32 %s1232_s15, 9  ;;  %s186_s21 = scalar_lea.sflag [#allocation3], %s1232_s15 }
  0x2f   : > { %s1239_s8 = scalar_lea.vmem [#allocation2], %s1235_s7 }
  0x30   : > { %1062 = dma.done.wait (%p1187_p8), %s186_s21, 8192  }
  0x31   : > { %1064 = vsyncadd (%p1187_p8), %s186_s21, 4294959104  ;;  %s196_s0 = scalar_lea.sflag [#allocation6], %s1232_s15  ;;  %s1247_s19 = scalar_lea.vmem [#allocation5], %s1235_s7 }
  0x32   : > { %1066 = dma.done.wait (%p1187_p8), %s196_s0, 8192  }
  0x33   : > { %1068 = vsyncadd (%p1187_p8), %s196_s0, 4294959104  ;;  %v226_v0 = vld [vmem:[%s1239_s8] sm:$0xff]  ;;  %v227_v1 = vld [vmem:[%s1239_s8 + $0x8] sm:$0xff]  ;;  %s1592_s20 = scalar_lea.vmem [#allocation7], %s1235_s7  ;;  %s844_s24 = sshll.u32 %s1091_s13, 7 }
  0x34   : > { %v228_v2 = vld [vmem:[%s1239_s8 + $0x10] sm:$0xff]  ;;  %v229_v3 = vld [vmem:[%s1239_s8 + $0x18] sm:$0xff]  ;;  %v290_v4 = vld [vmem:[%s1247_s19] sm:$0xff]  ;;  %s709_s29 = sadd.s32 %s1087_s12, %s844_s24  ;;  %s712_s27 = sshll.u32 %s1592_s20, 4  ;;  %s713_s27 = int_to_ptr.vmem [resolvable:$true] %s712_s27 }
  0x35   : > { %v291_v5 = vld [vmem:[%s1247_s19 + $0x8] sm:$0xff]  ;;  %v292_v6 = vld [vmem:[%s1247_s19 + $0x10] sm:$0xff]  ;;  %v293_v7 = vld [vmem:[%s1247_s19 + $0x18] sm:$0xff]  ;;  %v1261_v8 = vadd.f32 %v290_v4, %v226_v0  ;;  %s845_s13 = sshll.u32 %s709_s29, 3  ;;  %s699_s6 = scalar_lea.sflag [#allocation4], %s1232_s15 }
  0x36   : > { %v1263_v9 = vadd.f32 %v291_v5, %v227_v1  ;;  %v230_v10 = vld [vmem:[%s1239_s8 + $0x20] sm:$0xff]  ;;  %v1267_v12 = vadd.f32 %v292_v6, %v228_v2  ;;  %v1269_v13 = vadd.f32 %v293_v7, %v229_v3  ;;  %v231_v15 = vld [vmem:[%s1239_s8 + $0x28] sm:$0xff]  ;;  %v232_v19 = vld [vmem:[%s1239_s8 + $0x30] sm:$0xff]  ;;  %s711_s26 = scalar_lea.hbm %s1817_s2, %s845_s13  ;;  %s1021_s22 = scalar_lea.hbm %s1817_s2, 2048 }
  0x37   : > { %v294_v11 = vld [vmem:[%s1247_s19 + $0x20] sm:$0xff]  ;;  %v295_v16 = vld [vmem:[%s1247_s19 + $0x28] sm:$0xff]  ;;  %v296_v20 = vld [vmem:[%s1247_s19 + $0x30] sm:$0xff]  ;;  %s714_s4 = sshll.u32 %s711_s26, 4  ;;  %s715_s4 = int_to_ptr.hbm [resolvable:$true] %s714_s4 }
  0x38   : > { %v418_v14 = vadd.f32 %v1263_v9, %v1261_v8  ;;  %v1275_v17 = vadd.f32 %v294_v11, %v230_v10  ;;  %v1280_v21 = vadd.f32 %v295_v16, %v231_v15  ;;  %v233_v23 = vld [vmem:[%s1239_s8 + $0x38] sm:$0xff]  ;;  %v1285_v25 = vadd.f32 %v296_v20, %v232_v19  ;;  %v234_v27 = vld [vmem:[%s1239_s8 + $0x40] sm:$0xff]  ;;  %v235_v31 = vld [vmem:[%s1239_s8 + $0x48] sm:$0xff]  ;;  %s1015_s5 = sshra.s32 %s715_s4, 4  ;;  %s1016_s5 = int_to_ptr.hbm [resolvable:$true] %s1015_s5 }
  0x39   : > { %v297_v24 = vld [vmem:[%s1247_s19 + $0x38] sm:$0xff]  ;;  %v298_v28 = vld [vmem:[%s1247_s19 + $0x40] sm:$0xff]  ;;  %v299_v32 = vld [vmem:[%s1247_s19 + $0x48] sm:$0xff]  ;;  %s1017_s23 = scalar_lea.hbm %s1016_s5, 512  ;;  %p1022_p7 = scmp.lt.s32.totalorder %s1016_s5, %s1817_s2 }
  0x3a   : > { %v419_v18 = vadd.f32 %v418_v14, %v1267_v12  ;;  %v1290_v29 = vadd.f32 %v297_v24, %v233_v23  ;;  %v1295_v33 = vadd.f32 %v298_v28, %v234_v27  ;;  %v236_v35 = vld [vmem:[%s1239_s8 + $0x50] sm:$0xff]  ;;  %v1300_v37 = vadd.f32 %v299_v32, %v235_v31  ;;  %v237_v39 = vld [vmem:[%s1239_s8 + $0x58] sm:$0xff]  ;;  %v238_v43 = vld [vmem:[%s1239_s8 + $0x60] sm:$0xff]  ;;  %p1018_p3 = scmp.ne.s32.totalorder %s1016_s5, %s1017_s23  ;;  %p1023_p8 = scmp.lt.s32.totalorder %s1021_s22, %s1017_s23 }
  0x3b   : > { %v300_v36 = vld [vmem:[%s1247_s19 + $0x50] sm:$0xff]  ;;  %v301_v40 = vld [vmem:[%s1247_s19 + $0x58] sm:$0xff]  ;;  %v302_v44 = vld [vmem:[%s1247_s19 + $0x60] sm:$0xff] }
  0x3c   : > { %v420_v22 = vadd.f32 %v419_v18, %v1269_v13  ;;  %v1305_v41 = vadd.f32 %v300_v36, %v236_v35  ;;  %v1310_v45 = vadd.f32 %v301_v40, %v237_v39  ;;  %v239_v47 = vld [vmem:[%s1239_s8 + $0x68] sm:$0xff]  ;;  %v1315_v49 = vadd.f32 %v302_v44, %v238_v43  ;;  %v240_v51 = vld [vmem:[%s1239_s8 + $0x70] sm:$0xff]  ;;  %v241_v55 = vld [vmem:[%s1239_s8 + $0x78] sm:$0xff]  ;;  %p1019_p5 = pnand %p1018_p3, %p1191_p9  ;;  %p1024_p10 = por %p1023_p8, %p1022_p7 }
  0x3d   : > { %v303_v48 = vld [vmem:[%s1247_s19 + $0x68] sm:$0xff]  ;;  %v304_v52 = vld [vmem:[%s1247_s19 + $0x70] sm:$0xff]  ;;  %v305_v56 = vld [vmem:[%s1247_s19 + $0x78] sm:$0xff] }
  0x3e   : > { %v421_v26 = vadd.f32 %v420_v22, %v1275_v17  ;;  %v1320_v53 = vadd.f32 %v303_v48, %v239_v47  ;;  %v1325_v57 = vadd.f32 %v304_v52, %v240_v51  ;;  %v242_v59 = vld [vmem:[%s1239_s8 + $0x80] sm:$0xff]  ;;  %v1330_v61 = vadd.f32 %v305_v56, %v241_v55  ;;  %v243_v63 = vld [vmem:[%s1239_s8 + $0x88] sm:$0xff]  ;;  %v244_v3 = vld [vmem:[%s1239_s8 + $0x90] sm:$0xff]  ;;  %p1020_p6 = pneg %p1019_p5 }
  0x3f   : > { %v306_v60 = vld [vmem:[%s1247_s19 + $0x80] sm:$0xff]  ;;  %v307_v0 = vld [vmem:[%s1247_s19 + $0x88] sm:$0xff]  ;;  %v308_v4 = vld [vmem:[%s1247_s19 + $0x90] sm:$0xff] }
  0x40   : > { %v422_v30 = vadd.f32 %v421_v26, %v1280_v21  ;;  %v1335_v1 = vadd.f32 %v306_v60, %v242_v59  ;;  %v1340_v5 = vadd.f32 %v307_v0, %v243_v63  ;;  %v245_v7 = vld [vmem:[%s1239_s8 + $0x98] sm:$0xff]  ;;  %v1345_v11 = vadd.f32 %v308_v4, %v244_v3  ;;  %v246_v15 = vld [vmem:[%s1239_s8 + $0xa0] sm:$0xff]  ;;  %v247_v20 = vld [vmem:[%s1239_s8 + $0xa8] sm:$0xff]  ;;  %p1025_p11 = pnand %p1024_p10, %p1020_p6 }
  0x41   : > { %v309_v10 = vld [vmem:[%s1247_s19 + $0x98] sm:$0xff]  ;;  %v310_v16 = vld [vmem:[%s1247_s19 + $0xa0] sm:$0xff]  ;;  %v311_v22 = vld [vmem:[%s1247_s19 + $0xa8] sm:$0xff] }
  0x42   : > { %v423_v34 = vadd.f32 %v422_v30, %v1285_v25  ;;  %v1350_v18 = vadd.f32 %v309_v10, %v245_v7  ;;  %v1355_v23 = vadd.f32 %v310_v16, %v246_v15  ;;  %v248_v26 = vld [vmem:[%s1239_s8 + $0xb0] sm:$0xff]  ;;  %v1360_v28 = vadd.f32 %v311_v22, %v247_v20  ;;  %v249_v31 = vld [vmem:[%s1239_s8 + $0xb8] sm:$0xff]  ;;  %v250_v36 = vld [vmem:[%s1239_s8 + $0xc0] sm:$0xff] }
  0x43   : > { %v312_v27 = vld [vmem:[%s1247_s19 + $0xb0] sm:$0xff]  ;;  %v313_v32 = vld [vmem:[%s1247_s19 + $0xb8] sm:$0xff]  ;;  %v315_v43 = vld [vmem:[%s1247_s19 + $0xc8] sm:$0xff] }
  0x44   : > { %v424_v38 = vadd.f32 %v423_v34, %v1290_v29  ;;  %v1365_v34 = vadd.f32 %v312_v27, %v248_v26  ;;  %v1370_v39 = vadd.f32 %v313_v32, %v249_v31  ;;  %v252_v47 = vld [vmem:[%s1239_s8 + $0xd0] sm:$0xff]  ;;  %v253_v52 = vld [vmem:[%s1239_s8 + $0xd8] sm:$0xff]  ;;  %v318_v59 = vld [vmem:[%s1247_s19 + $0xe0] sm:$0xff] }
  0x45   : > { %v316_v48 = vld [vmem:[%s1247_s19 + $0xd0] sm:$0xff]  ;;  %v255_v63 = vld [vmem:[%s1239_s8 + $0xe8] sm:$0xff]  ;;  %v321_v15 = vld [vmem:[%s1247_s19 + $0xf8] sm:$0xff] }
  0x46   : > { %v425_v42 = vadd.f32 %v424_v38, %v1295_v33  ;;  %v314_v38 = vld [vmem:[%s1247_s19 + $0xc0] sm:$0xff]  ;;  %v1385_v55 = vadd.f32 %v316_v48, %v252_v47  ;;  %v319_v0 = vld [vmem:[%s1247_s19 + $0xe8] sm:$0xff]  ;;  %v256_v4 = vld [vmem:[%s1239_s8 + $0xf0] sm:$0xff] }
  0x47   : > { %v1375_v44 = vadd.f32 %v314_v38, %v250_v36  ;;  %v1400_v7 = vadd.f32 %v319_v0, %v255_v63  ;;  %v258_v20 = vld [vmem:[%s1239_s8 + $0x100] sm:$0xff]  ;;  %v259_v27 = vld [vmem:[%s1239_s8 + $0x108] sm:$0xff]  ;;  %v324_v36 = vld [vmem:[%s1247_s19 + $0x110] sm:$0xff] }
  0x48   : > { %v426_v46 = vadd.f32 %v425_v42, %v1300_v37  ;;  %v251_v42 = vld [vmem:[%s1239_s8 + $0xc8] sm:$0xff]  ;;  %v322_v22 = vld [vmem:[%s1247_s19 + $0x100] sm:$0xff]  ;;  %v264_v63 = vld [vmem:[%s1239_s8 + $0x130] sm:$0xff] }
  0x49   : > { %v1415_v31 = vadd.f32 %v322_v22, %v258_v20  ;;  %v262_v48 = vld [vmem:[%s1239_s8 + $0x120] sm:$0xff]  ;;  %v328_v0 = vld [vmem:[%s1247_s19 + $0x130] sm:$0xff] }
  0x4a   : > { %v427_v50 = vadd.f32 %v426_v46, %v1305_v41  ;;  %v330_v20 = vld [vmem:[%s1247_s19 + $0x140] sm:$0xff] }
  0x4c   : > { %v428_v54 = vadd.f32 %v427_v50, %v1310_v45  ;;  %v1380_v50 = vadd.f32 %v315_v43, %v251_v42  ;;  %v261_v42 = vld [vmem:[%s1239_s8 + $0x118] sm:$0xff] }
  0x4d   : > { %v325_v43 = vld [vmem:[%s1247_s19 + $0x118] sm:$0xff] }
  0x4e   : > { %v429_v58 = vadd.f32 %v428_v54, %v1315_v49  ;;  %v317_v54 = vld [vmem:[%s1247_s19 + $0xd8] sm:$0xff] }
  0x4f   : > { %v1390_v60 = vadd.f32 %v317_v54, %v253_v52  ;;  %v1430_v52 = vadd.f32 %v325_v43, %v261_v42 }
  0x50   : > { %v430_v62 = vadd.f32 %v429_v58, %v1320_v53  ;;  %v254_v58 = vld [vmem:[%s1239_s8 + $0xe0] sm:$0xff] }
  0x52   : > { %v431_v2 = vadd.f32 %v430_v62, %v1325_v57 }
  0x54   : > { %v432_v6 = vadd.f32 %v431_v2, %v1330_v61  ;;  %v1395_v2 = vadd.f32 %v318_v59, %v254_v58  ;;  %v327_v58 = vld [vmem:[%s1247_s19 + $0x128] sm:$0xff] }
  0x56   : > { %v433_v14 = vadd.f32 %v432_v6, %v1335_v1  ;;  %v320_v6 = vld [vmem:[%s1247_s19 + $0xf0] sm:$0xff] }
  0x57   : > { %v1405_v16 = vadd.f32 %v320_v6, %v256_v4  ;;  %v265_v6 = vld [vmem:[%s1239_s8 + $0x138] sm:$0xff] }
  0x58   : > { %v434_v19 = vadd.f32 %v433_v14, %v1340_v5  ;;  %v257_v14 = vld [vmem:[%s1239_s8 + $0xf8] sm:$0xff] }
  0x5a   : > { %v435_v24 = vadd.f32 %v434_v19, %v1345_v11 }
  0x5c   : > { %v436_v30 = vadd.f32 %v435_v24, %v1350_v18  ;;  %v1410_v24 = vadd.f32 %v321_v15, %v257_v14  ;;  %v1445_v14 = vadd.f32 %v328_v0, %v264_v63  ;;  %v271_v0 = vld [vmem:[%s1239_s8 + $0x168] sm:$0xff] }
  0x5e   : > { %v437_v35 = vadd.f32 %v436_v30, %v1355_v23  ;;  %v323_v30 = vld [vmem:[%s1247_s19 + $0x108] sm:$0xff] }
  0x5f   : > { %v1420_v38 = vadd.f32 %v323_v30, %v259_v27  ;;  %v267_v27 = vld [vmem:[%s1239_s8 + $0x148] sm:$0xff] }
  0x60   : > { %v438_v40 = vadd.f32 %v437_v35, %v1360_v28  ;;  %v260_v35 = vld [vmem:[%s1239_s8 + $0x110] sm:$0xff]  ;;  %v331_v30 = vld [vmem:[%s1247_s19 + $0x148] sm:$0xff] }
  0x61   : > { %v1460_v42 = vadd.f32 %v331_v30, %v267_v27  ;;  %v273_v27 = vld [vmem:[%s1239_s8 + $0x178] sm:$0xff] }
  0x62   : > { %v439_v46 = vadd.f32 %v438_v40, %v1365_v34  ;;  %v337_v30 = vld [vmem:[%s1247_s19 + $0x178] sm:$0xff] }
  0x64   : > { %v440_v51 = vadd.f32 %v439_v46, %v1370_v39  ;;  %v1425_v46 = vadd.f32 %v324_v36, %v260_v35  ;;  %v268_v36 = vld [vmem:[%s1239_s8 + $0x150] sm:$0xff] }
  0x66   : > { %v441_v56 = vadd.f32 %v440_v51, %v1375_v44  ;;  %v326_v51 = vld [vmem:[%s1247_s19 + $0x120] sm:$0xff] }
  0x67   : > { %v1435_v59 = vadd.f32 %v326_v51, %v262_v48  ;;  %v333_v48 = vld [vmem:[%s1247_s19 + $0x158] sm:$0xff] }
  0x68   : > { %v442_v62 = vadd.f32 %v441_v56, %v1380_v50  ;;  %v263_v56 = vld [vmem:[%s1239_s8 + $0x128] sm:$0xff] }
  0x6a   : > { %v443_v3 = vadd.f32 %v442_v62, %v1385_v55 }
  0x6c   : > { %v444_v10 = vadd.f32 %v443_v3, %v1390_v60  ;;  %v1440_v3 = vadd.f32 %v327_v58, %v263_v56  ;;  %v270_v56 = vld [vmem:[%s1239_s8 + $0x160] sm:$0xff] }
  0x6d   : > { %v334_v58 = vld [vmem:[%s1247_s19 + $0x160] sm:$0xff] }
  0x6e   : > { %v445_v19 = vadd.f32 %v444_v10, %v1395_v2  ;;  %v329_v10 = vld [vmem:[%s1247_s19 + $0x138] sm:$0xff] }
  0x6f   : > { %v1450_v22 = vadd.f32 %v329_v10, %v265_v6  ;;  %v1475_v6 = vadd.f32 %v334_v58, %v270_v56  ;;  %v339_v56 = vld [vmem:[%s1247_s19 + $0x188] sm:$0xff] }
  0x70   : > { %v446_v26 = vadd.f32 %v445_v19, %v1400_v7  ;;  %v266_v19 = vld [vmem:[%s1239_s8 + $0x140] sm:$0xff] }
  0x71   : > { %1848 = vst [vmem:[#allocation14_spill] sm:$0xff] %v1475_v6 }
  0x72   : > { %v447_v32 = vadd.f32 %v446_v26, %v1405_v16 }
  0x74   : > { %v448_v40 = vadd.f32 %v447_v32, %v1410_v24  ;;  %v1455_v32 = vadd.f32 %v330_v20, %v266_v19  ;;  %v336_v19 = vld [vmem:[%s1247_s19 + $0x170] sm:$0xff] }
  0x76   : > { %v449_v47 = vadd.f32 %v448_v40, %v1415_v31  ;;  %v332_v40 = vld [vmem:[%s1247_s19 + $0x150] sm:$0xff] }
  0x77   : > { %v1465_v51 = vadd.f32 %v332_v40, %v268_v36  ;;  %v274_v40 = vld [vmem:[%s1239_s8 + $0x180] sm:$0xff] }
  0x78   : > { %v450_v54 = vadd.f32 %v449_v47, %v1420_v38  ;;  %v269_v47 = vld [vmem:[%s1239_s8 + $0x158] sm:$0xff] }
  0x7a   : > { %v451_v62 = vadd.f32 %v450_v54, %v1425_v46 }
  0x7c   : > { %v452_v4 = vadd.f32 %v451_v62, %v1430_v52  ;;  %v1470_v62 = vadd.f32 %v333_v48, %v269_v47  ;;  %v1490_v47 = vadd.f32 %v337_v30, %v273_v27 }
  0x7e   : > { %v453_v15 = vadd.f32 %v452_v4, %v1435_v59  ;;  %v335_v4 = vld [vmem:[%s1247_s19 + $0x168] sm:$0xff]  ;;  %1851 = vst [vmem:[#allocation17_spill] sm:$0xff] %v1490_v47 }
  0x7f   : > { %v1480_v20 = vadd.f32 %v335_v4, %v271_v0  ;;  %v276_v0 = vld [vmem:[%s1239_s8 + $0x190] sm:$0xff] }
  0x80   : > { %v454_v26 = vadd.f32 %v453_v15, %v1440_v3  ;;  %v272_v15 = vld [vmem:[%s1239_s8 + $0x170] sm:$0xff] }
  0x81   : > { %1849 = vst [vmem:[#allocation15_spill] sm:$0xff] %v1480_v20  ;;  %v340_v4 = vld [vmem:[%s1247_s19 + $0x190] sm:$0xff] }
  0x82   : > { %v455_v35 = vadd.f32 %v454_v26, %v1445_v14  ;;  %v1505_v27 = vadd.f32 %v340_v4, %v276_v0  ;;  %v280_v0 = vld [vmem:[%s1239_s8 + $0x1b0] sm:$0xff] }
  0x83   : > { %v344_v4 = vld [vmem:[%s1247_s19 + $0x1b0] sm:$0xff] }
  0x84   : > { %v456_v43 = vadd.f32 %v455_v35, %v1450_v22  ;;  %v1485_v35 = vadd.f32 %v336_v19, %v272_v15  ;;  %v277_v19 = vld [vmem:[%s1239_s8 + $0x198] sm:$0xff]  ;;  %1854 = vst [vmem:[#allocation20_spill] sm:$0xff] %v1505_v27 }
  0x86   : > { %v457_v54 = vadd.f32 %v456_v43, %v1455_v32  ;;  %1850 = vst [vmem:[#allocation16_spill] sm:$0xff] %v1485_v35  ;;  %v338_v43 = vld [vmem:[%s1247_s19 + $0x180] sm:$0xff] }
  0x87   : > { %v1495_v58 = vadd.f32 %v338_v43, %v274_v40  ;;  %v342_v40 = vld [vmem:[%s1247_s19 + $0x1a0] sm:$0xff] }
  0x88   : > { %v458_v63 = vadd.f32 %v457_v54, %v1460_v42  ;;  %v275_v54 = vld [vmem:[%s1239_s8 + $0x188] sm:$0xff] }
  0x89   : > { %1852 = vst [vmem:[#allocation18_spill] sm:$0xff] %v1495_v58 }
  0x8a   : > { %v459_v10 = vadd.f32 %v458_v63, %v1465_v51 }
  0x8c   : > { %v460_v26 = vadd.f32 %v459_v10, %v1470_v62  ;;  %v1500_v10 = vadd.f32 %v339_v56, %v275_v54  ;;  %v279_v54 = vld [vmem:[%s1239_s8 + $0x1a8] sm:$0xff] }
  0x8d   : > { %v343_v56 = vld [vmem:[%s1247_s19 + $0x1a8] sm:$0xff] }
  0x8e   : > { %v461_v36 = vadd.f32 %v460_v26, %v1475_v6  ;;  %1853 = vst [vmem:[#allocation19_spill] sm:$0xff] %v1500_v10  ;;  %v341_v26 = vld [vmem:[%s1247_s19 + $0x198] sm:$0xff] }
  0x8f   : > { %v1510_v43 = vadd.f32 %v341_v26, %v277_v19  ;;  %v281_v19 = vld [vmem:[%s1239_s8 + $0x1b8] sm:$0xff] }
  0x90   : > { %v462_v48 = vadd.f32 %v461_v36, %v1480_v20  ;;  %v278_v36 = vld [vmem:[%s1239_s8 + $0x1a0] sm:$0xff]  ;;  %v345_v26 = vld [vmem:[%s1247_s19 + $0x1b8] sm:$0xff]  ;;  %v351_v20 = vld [vmem:[%s1247_s19 + $0x1e8] sm:$0xff] }
  0x91   : > { %1855 = vst [vmem:[#allocation21_spill] sm:$0xff] %v1510_v43 }
  0x92   : > { %v463_v63 = vadd.f32 %v462_v48, %v1485_v35 }
  0x94   : > { %v464_v15 = vadd.f32 %v463_v63, %v1490_v47  ;;  %v1515_v63 = vadd.f32 %v342_v40, %v278_v36  ;;  %v282_v36 = vld [vmem:[%s1239_s8 + $0x1c0] sm:$0xff] }
  0x95   : > { %v346_v40 = vld [vmem:[%s1247_s19 + $0x1c0] sm:$0xff] }
  0x96   : > { %v465_v30 = vadd.f32 %v464_v15, %v1495_v58  ;;  %1856 = vst [vmem:[#allocation22_spill] sm:$0xff] %v1515_v63  ;;  %v1520_v15 = vadd.f32 %v343_v56, %v279_v54  ;;  %v283_v54 = vld [vmem:[%s1239_s8 + $0x1c8] sm:$0xff] }
  0x97   : > { %v347_v56 = vld [vmem:[%s1247_s19 + $0x1c8] sm:$0xff] }
  0x98   : > { %v466_v48 = vadd.f32 %v465_v30, %v1500_v10  ;;  %1857 = vst [vmem:[#allocation23_spill] sm:$0xff] %v1520_v15  ;;  %v1525_v30 = vadd.f32 %v344_v4, %v280_v0  ;;  %v284_v0 = vld [vmem:[%s1239_s8 + $0x1d0] sm:$0xff] }
  0x99   : > { %v348_v4 = vld [vmem:[%s1247_s19 + $0x1d0] sm:$0xff] }
  0x9a   : > { %v467_v47 = vadd.f32 %v466_v48, %v1505_v27  ;;  %1858 = vst [vmem:[#allocation24_spill] sm:$0xff] %v1525_v30  ;;  %v1530_v48 = vadd.f32 %v345_v26, %v281_v19  ;;  %v285_v19 = vld [vmem:[%s1239_s8 + $0x1d8] sm:$0xff] }
  0x9b   : > { %v349_v26 = vld [vmem:[%s1247_s19 + $0x1d8] sm:$0xff] }
  0x9c   : > { %v468_v58 = vadd.f32 %v467_v47, %v1510_v43  ;;  %1859 = vst [vmem:[#allocation25_spill] sm:$0xff] %v1530_v48  ;;  %v1535_v47 = vadd.f32 %v346_v40, %v282_v36  ;;  %v286_v36 = vld [vmem:[%s1239_s8 + $0x1e0] sm:$0xff]  ;;  %v1550_v35 = vadd.f32 %v349_v26, %v285_v19 }
  0x9d   : > { %v350_v40 = vld [vmem:[%s1247_s19 + $0x1e0] sm:$0xff] }
  0x9e   : > { %v469_v10 = vadd.f32 %v468_v58, %v1515_v63  ;;  %1860 = vst [vmem:[#allocation26_spill] sm:$0xff] %v1535_v47  ;;  %v1540_v58 = vadd.f32 %v347_v56, %v283_v54  ;;  %v1555_v54 = vadd.f32 %v350_v40, %v286_v36  ;;  %v288_v56 = vld [vmem:[%s1239_s8 + $0x1f0] sm:$0xff] }
  0x9f   : > { %1863 = vst [vmem:[#allocation29_spill] sm:$0xff] %v1550_v35 }
  0xa0   : > { %v470_v27 = vadd.f32 %v469_v10, %v1520_v15  ;;  %1861 = vst [vmem:[#allocation27_spill] sm:$0xff] %v1540_v58  ;;  %v1545_v10 = vadd.f32 %v348_v4, %v284_v0  ;;  %v289_v4 = vld [vmem:[%s1239_s8 + $0x1f8] sm:$0xff] }
  0xa1   : > { %1864 = vst [vmem:[#allocation30_spill] sm:$0xff] %v1555_v54 }
  0xa2   : > { %v471_v43 = vadd.f32 %v470_v27, %v1525_v30  ;;  %1862 = vst [vmem:[#allocation28_spill] sm:$0xff] %v1545_v10  ;;  %v287_v30 = vld [vmem:[%s1239_s8 + $0x1e8] sm:$0xff] }
  0xa3   : > { %v1560_v6 = vadd.f32 %v351_v20, %v287_v30 }
  0xa4   : > { %v472_v63 = vadd.f32 %v471_v43, %v1530_v48  ;;  %v352_v48 = vld [vmem:[%s1247_s19 + $0x1f0] sm:$0xff] }
  0xa6   : > { %v473_v15 = vadd.f32 %v472_v63, %v1535_v47  ;;  %v353_v63 = vld [vmem:[%s1247_s19 + $0x1f8] sm:$0xff]  ;;  %v1565_v47 = vadd.f32 %v352_v48, %v288_v56 }
  0xa7   : > { %v1568_v26 = vadd.f32 %v353_v63, %v289_v4 }
  0xa8   : > { %v474_v27 = vadd.f32 %v473_v15, %v1540_v58 }
  0xaa   : > { %v475_v43 = vadd.f32 %v474_v27, %v1545_v10 }
  0xac   : > { %v476_v0 = vadd.f32 %v475_v43, %v1550_v35 }
  0xae   : > { %v477_v19 = vadd.f32 %v476_v0, %v1555_v54 }
  0xb0   : > { %v478_v15 = vadd.f32 %v477_v19, %v1560_v6 }
  0xb2   : > { %v479_v36 = vadd.f32 %v478_v15, %v1565_v47 }
  0xb4   : > { %v480_v40 = vadd.f32 %v479_v36, %v1568_v26 }
  0xb6   : > { %v481_v27 = vrot.slane %v480_v40, 4 }
  0xb8   : > { %v482_v10 = vadd.f32 %v481_v27, %v480_v40 }
  0xba   : > { %v483_v20 = vrot.slane %v482_v10, 2 }
  0xbc   : > { %v484_v30 = vadd.f32 %v483_v20, %v482_v10 }
  0xbe   : > { %v485_v58 = vrot.slane %v484_v30, 1 }
  0xc0   : > { %v486_v43 = vadd.f32 %v485_v58, %v484_v30 }
  0xc2   : > { %v842_v35 = vmul.f32 -1.442695, %v486_v43 }
  0xc4   : > { %937 = vpow2.f32 %v842_v35 }
  0xca   : > { %v938_v48 = vpop.eup %937 }
  0xcb   : > { %v490_v56 = vadd.f32 1.0, %v938_v48 }
  0xcd   : > { %939 = vrcp.f32 %v490_v56  ;;  %v502_v63 = vand.u32 2147483648, %v490_v56  ;;  %vm496_vm0 = vweird.f32 %v490_v56  ;;  %v500_v19 = vand.u32 2147483647, %v490_v56 }
  0xcf   : > { %v503_v36 = vor.u32 1.1754944e-38, %v502_v63  ;;  %vm501_vm3 = vcmp.eq.f32.partialorder %v500_v19, 8.507059e+37 }
  0xd3   : > { %v940_v0 = vpop.eup %939 }
  0xd4   : > { %v492_v4 = vmul.f32 %v940_v0, %v490_v56  ;;  %vm497_vm1 = vweird.f32 %v940_v0 }
  0xd5   : > { %vm498_vm2 = vmor %vm496_vm0, %vm497_vm1 }
  0xd6   : > { %v493_v54 = vsub.f32 1.0, %v492_v4 }
  0xd8   : > { %v494_v15 = vmul.f32 %v940_v0, %v493_v54 }
  0xda   : > { %v495_v40 = vadd.f32 %v940_v0, %v494_v15 }
  0xdc   : > { %v499_v10 = vsel %vm498_vm2, %v940_v0, %v495_v40 }
  0xdd   : > { %v1573_v58 = vsel %vm501_vm3, %v503_v36, %v499_v10 }
  0xde   : > { %v506_v35 = vmul.f32 %v1573_v58, %v1261_v8  ;;  %v507_v27 = vmul.f32 %v1573_v58, %v1263_v9  ;;  %v508_v20 = vmul.f32 %v1573_v58, %v1267_v12  ;;  %v509_v54 = vmul.f32 %v1573_v58, %v1269_v13 }
  0xdf   : > { %v510_v30 = vmul.f32 %v1573_v58, %v1275_v17  ;;  %v511_v43 = vmul.f32 %v1573_v58, %v1280_v21  ;;  %v512_v8 = vmul.f32 %v1573_v58, %v1285_v25  ;;  %v513_v9 = vmul.f32 %v1573_v58, %v1290_v29 }
  0xe0   : > { %v570_v48 = vmax.f32 %v506_v35, 0.0  ;;  %v571_v56 = vmax.f32 %v507_v27, 0.0  ;;  %v572_v0 = vmax.f32 %v508_v20, 0.0  ;;  %v573_v4 = vmax.f32 %v509_v54, 0.0 }
  0xe1   : > { %v574_v12 = vmax.f32 %v510_v30, 0.0  ;;  %v514_v13 = vmul.f32 %v1573_v58, %v1295_v33  ;;  %v575_v17 = vmax.f32 %v511_v43, 0.0  ;;  %v515_v21 = vmul.f32 %v1573_v58, %v1300_v37 }
  0xe2   : > { %634 = vst [vmem:[%s1592_s20] sm:$0xff] %v570_v48  ;;  %v576_v25 = vmax.f32 %v512_v8, 0.0  ;;  %v516_v29 = vmul.f32 %v1573_v58, %v1305_v41  ;;  %v577_v63 = vmax.f32 %v513_v9, 0.0  ;;  %v517_v19 = vmul.f32 %v1573_v58, %v1310_v45 }
  0xe3   : > { %635 = vst [vmem:[%s1592_s20 + $0x8] sm:$0xff] %v571_v56  ;;  %v578_v33 = vmax.f32 %v514_v13, 0.0  ;;  %v518_v15 = vmul.f32 %v1573_v58, %v1315_v49  ;;  %v579_v37 = vmax.f32 %v515_v21, 0.0  ;;  %v519_v36 = vmul.f32 %v1573_v58, %v1320_v53 }
  0xe4   : > { %636 = vst [vmem:[%s1592_s20 + $0x10] sm:$0xff] %v572_v0  ;;  %v580_v41 = vmax.f32 %v516_v29, 0.0  ;;  %v520_v40 = vmul.f32 %v1573_v58, %v1325_v57  ;;  %v581_v45 = vmax.f32 %v517_v19, 0.0  ;;  %v521_v10 = vmul.f32 %v1573_v58, %v1330_v61 }
  0xe5   : > { %637 = vst [vmem:[%s1592_s20 + $0x18] sm:$0xff] %v573_v4  ;;  %v582_v49 = vmax.f32 %v518_v15, 0.0  ;;  %v522_v35 = vmul.f32 %v1573_v58, %v1335_v1  ;;  %v583_v53 = vmax.f32 %v519_v36, 0.0  ;;  %v523_v27 = vmul.f32 %v1573_v58, %v1340_v5 }
  0xe6   : > { %638 = vst [vmem:[%s1592_s20 + $0x20] sm:$0xff] %v574_v12  ;;  %v584_v57 = vmax.f32 %v520_v40, 0.0  ;;  %v524_v20 = vmul.f32 %v1573_v58, %v1345_v11  ;;  %v585_v61 = vmax.f32 %v521_v10, 0.0  ;;  %v525_v54 = vmul.f32 %v1573_v58, %v1350_v18 }
  0xe7   : > { %639 = vst [vmem:[%s1592_s20 + $0x28] sm:$0xff] %v575_v17  ;;  %v586_v1 = vmax.f32 %v522_v35, 0.0  ;;  %v526_v30 = vmul.f32 %v1573_v58, %v1355_v23  ;;  %v587_v5 = vmax.f32 %v523_v27, 0.0  ;;  %v527_v43 = vmul.f32 %v1573_v58, %v1360_v28 }
  0xe8   : > { %640 = vst [vmem:[%s1592_s20 + $0x30] sm:$0xff] %v576_v25  ;;  %v588_v11 = vmax.f32 %v524_v20, 0.0  ;;  %v528_v48 = vmul.f32 %v1573_v58, %v1365_v34  ;;  %v589_v18 = vmax.f32 %v525_v54, 0.0  ;;  %v529_v56 = vmul.f32 %v1573_v58, %v1370_v39 }
  0xe9   : > { %641 = vst [vmem:[%s1592_s20 + $0x38] sm:$0xff] %v577_v63  ;;  %v590_v23 = vmax.f32 %v526_v30, 0.0  ;;  %v530_v0 = vmul.f32 %v1573_v58, %v1375_v44  ;;  %v591_v28 = vmax.f32 %v527_v43, 0.0  ;;  %v531_v8 = vmul.f32 %v1573_v58, %v1380_v50  ;;  %v1869_v30 = vld [vmem:[#allocation18_spill] sm:$0xff] }
  0xea   : > { %642 = vst [vmem:[%s1592_s20 + $0x40] sm:$0xff] %v578_v33  ;;  %v592_v34 = vmax.f32 %v528_v48, 0.0  ;;  %v532_v4 = vmul.f32 %v1573_v58, %v1385_v55  ;;  %v593_v39 = vmax.f32 %v529_v56, 0.0  ;;  %v533_v9 = vmul.f32 %v1573_v58, %v1390_v60  ;;  %v1871_v56 = vld [vmem:[#allocation20_spill] sm:$0xff] }
  0xeb   : > { %643 = vst [vmem:[%s1592_s20 + $0x48] sm:$0xff] %v579_v37  ;;  %v594_v44 = vmax.f32 %v530_v0, 0.0  ;;  %v534_v12 = vmul.f32 %v1573_v58, %v1395_v2  ;;  %v595_v50 = vmax.f32 %v531_v8, 0.0  ;;  %v535_v13 = vmul.f32 %v1573_v58, %v1400_v7 }
  0xec   : > { %644 = vst [vmem:[%s1592_s20 + $0x50] sm:$0xff] %v580_v41  ;;  %v596_v55 = vmax.f32 %v532_v4, 0.0  ;;  %v536_v17 = vmul.f32 %v1573_v58, %v1405_v16  ;;  %v597_v60 = vmax.f32 %v533_v9, 0.0  ;;  %v537_v21 = vmul.f32 %v1573_v58, %v1410_v24  ;;  %v1873_v4 = vld [vmem:[#allocation22_spill] sm:$0xff] }
  0xed   : > { %645 = vst [vmem:[%s1592_s20 + $0x58] sm:$0xff] %v581_v45  ;;  %v598_v2 = vmax.f32 %v534_v12, 0.0  ;;  %v538_v25 = vmul.f32 %v1573_v58, %v1415_v31  ;;  %v599_v7 = vmax.f32 %v535_v13, 0.0  ;;  %v539_v29 = vmul.f32 %v1573_v58, %v1420_v38  ;;  %v1875_v13 = vld [vmem:[#allocation24_spill] sm:$0xff] }
  0xee   : > { %646 = vst [vmem:[%s1592_s20 + $0x60] sm:$0xff] %v582_v49  ;;  %v600_v16 = vmax.f32 %v536_v17, 0.0  ;;  %v540_v63 = vmul.f32 %v1573_v58, %v1425_v46  ;;  %v601_v24 = vmax.f32 %v537_v21, 0.0  ;;  %v541_v19 = vmul.f32 %v1573_v58, %v1430_v52  ;;  %v1865_v49 = vld [vmem:[#allocation14_spill] sm:$0xff] }
  0xef   : > { %647 = vst [vmem:[%s1592_s20 + $0x68] sm:$0xff] %v583_v53  ;;  %v602_v31 = vmax.f32 %v538_v25, 0.0  ;;  %v542_v33 = vmul.f32 %v1573_v58, %v1435_v59  ;;  %v603_v38 = vmax.f32 %v539_v29, 0.0  ;;  %v543_v15 = vmul.f32 %v1573_v58, %v1440_v3  ;;  %v1866_v53 = vld [vmem:[#allocation15_spill] sm:$0xff]  ;;  %v1877_v25 = vld [vmem:[#allocation26_spill] sm:$0xff] }
  0xf0   : > { %648 = vst [vmem:[%s1592_s20 + $0x70] sm:$0xff] %v584_v57  ;;  %v604_v46 = vmax.f32 %v540_v63, 0.0  ;;  %v544_v37 = vmul.f32 %v1573_v58, %v1445_v14  ;;  %v605_v52 = vmax.f32 %v541_v19, 0.0  ;;  %v545_v36 = vmul.f32 %v1573_v58, %v1450_v22  ;;  %v1867_v57 = vld [vmem:[#allocation16_spill] sm:$0xff] }
  0xf1   : > { %649 = vst [vmem:[%s1592_s20 + $0x78] sm:$0xff] %v585_v61  ;;  %v606_v59 = vmax.f32 %v542_v33, 0.0  ;;  %v546_v41 = vmul.f32 %v1573_v58, %v1455_v32  ;;  %v607_v3 = vmax.f32 %v543_v15, 0.0  ;;  %v547_v40 = vmul.f32 %v1573_v58, %v1460_v42  ;;  %v1868_v61 = vld [vmem:[#allocation17_spill] sm:$0xff]  ;;  %v1879_v19 = vld [vmem:[#allocation28_spill] sm:$0xff] }
  0xf2   : > { %650 = vst [vmem:[%s1592_s20 + $0x80] sm:$0xff] %v586_v1  ;;  %v608_v14 = vmax.f32 %v544_v37, 0.0  ;;  %v548_v45 = vmul.f32 %v1573_v58, %v1465_v51  ;;  %v609_v22 = vmax.f32 %v545_v36, 0.0  ;;  %v549_v10 = vmul.f32 %v1573_v58, %v1470_v62  ;;  %v1881_v37 = vld [vmem:[#allocation30_spill] sm:$0xff] }
  0xf3   : > { %651 = vst [vmem:[%s1592_s20 + $0x88] sm:$0xff] %v587_v5  ;;  %v610_v32 = vmax.f32 %v546_v41, 0.0  ;;  %v550_v35 = vmul.f32 %v1573_v58, %v1865_v49  ;;  %v611_v42 = vmax.f32 %v547_v40, 0.0  ;;  %v551_v27 = vmul.f32 %v1573_v58, %v1866_v53 }
  0xf4   : > { %652 = vst [vmem:[%s1592_s20 + $0x90] sm:$0xff] %v588_v11  ;;  %v612_v51 = vmax.f32 %v548_v45, 0.0  ;;  %v552_v20 = vmul.f32 %v1573_v58, %v1867_v57  ;;  %v613_v62 = vmax.f32 %v549_v10, 0.0  ;;  %v553_v54 = vmul.f32 %v1573_v58, %v1868_v61  ;;  %v1870_v11 = vld [vmem:[#allocation19_spill] sm:$0xff] }
  0xf5   : > { %653 = vst [vmem:[%s1592_s20 + $0x98] sm:$0xff] %v589_v18  ;;  %v614_v1 = vmax.f32 %v550_v35, 0.0  ;;  %v554_v5 = vmul.f32 %v1573_v58, %v1869_v30  ;;  %v615_v43 = vmax.f32 %v551_v27, 0.0  ;;  %v555_v48 = vmul.f32 %v1573_v58, %v1870_v11 }
  0xf6   : > { %654 = vst [vmem:[%s1592_s20 + $0xa0] sm:$0xff] %v590_v23  ;;  %v616_v18 = vmax.f32 %v552_v20, 0.0  ;;  %v556_v23 = vmul.f32 %v1573_v58, %v1871_v56  ;;  %v617_v0 = vmax.f32 %v553_v54, 0.0 }
  0xf7   : > { %655 = vst [vmem:[%s1592_s20 + $0xa8] sm:$0xff] %v591_v28  ;;  %v1872_v28 = vld [vmem:[#allocation21_spill] sm:$0xff]  ;;  %v619_v9 = vmax.f32 %v555_v48, 0.0 }
  0xf8   : > { %656 = vst [vmem:[%s1592_s20 + $0xb0] sm:$0xff] %v592_v34  ;;  %v557_v8 = vmul.f32 %v1573_v58, %v1872_v28  ;;  %v618_v34 = vmax.f32 %v554_v5, 0.0 }
  0xf9   : > { %657 = vst [vmem:[%s1592_s20 + $0xb8] sm:$0xff] %v593_v39  ;;  %v558_v39 = vmul.f32 %v1573_v58, %v1873_v4 }
  0xfa   : > { %658 = vst [vmem:[%s1592_s20 + $0xc0] sm:$0xff] %v594_v44  ;;  %v1874_v44 = vld [vmem:[#allocation23_spill] sm:$0xff]  ;;  %v621_v17 = vmax.f32 %v557_v8, 0.0 }
  0xfb   : > { %659 = vst [vmem:[%s1592_s20 + $0xc8] sm:$0xff] %v595_v50  ;;  %v559_v12 = vmul.f32 %v1573_v58, %v1874_v44  ;;  %v620_v50 = vmax.f32 %v556_v23, 0.0 }
  0xfc   : > { %660 = vst [vmem:[%s1592_s20 + $0xd0] sm:$0xff] %v596_v55  ;;  %v560_v55 = vmul.f32 %v1573_v58, %v1875_v13 }
  0xfd   : > { %661 = vst [vmem:[%s1592_s20 + $0xd8] sm:$0xff] %v597_v60  ;;  %v1876_v60 = vld [vmem:[#allocation25_spill] sm:$0xff]  ;;  %v623_v29 = vmax.f32 %v559_v12, 0.0 }
  0xfe   : > { %662 = vst [vmem:[%s1592_s20 + $0xe0] sm:$0xff] %v598_v2  ;;  %v561_v21 = vmul.f32 %v1573_v58, %v1876_v60  ;;  %v622_v2 = vmax.f32 %v558_v39, 0.0 }
  0xff   : > { %663 = vst [vmem:[%s1592_s20 + $0xe8] sm:$0xff] %v599_v7  ;;  %v562_v7 = vmul.f32 %v1573_v58, %v1877_v25 }
 0x100   : > { %664 = vst [vmem:[%s1592_s20 + $0xf0] sm:$0xff] %v600_v16  ;;  %v1878_v16 = vld [vmem:[#allocation27_spill] sm:$0xff]  ;;  %v625_v33 = vmax.f32 %v561_v21, 0.0 }
 0x101   : > { %665 = vst [vmem:[%s1592_s20 + $0xf8] sm:$0xff] %v601_v24  ;;  %v563_v63 = vmul.f32 %v1573_v58, %v1878_v16  ;;  %v624_v24 = vmax.f32 %v560_v55, 0.0 }
 0x102   : > { %666 = vst [vmem:[%s1592_s20 + $0x100] sm:$0xff] %v602_v31  ;;  %v564_v31 = vmul.f32 %v1573_v58, %v1879_v19 }
 0x103   : > { %667 = vst [vmem:[%s1592_s20 + $0x108] sm:$0xff] %v603_v38  ;;  %v1880_v38 = vld [vmem:[#allocation29_spill] sm:$0xff]  ;;  %v627_v36 = vmax.f32 %v563_v63, 0.0 }
 0x104   : > { %668 = vst [vmem:[%s1592_s20 + $0x110] sm:$0xff] %v604_v46  ;;  %v565_v15 = vmul.f32 %v1573_v58, %v1880_v38  ;;  %v626_v46 = vmax.f32 %v562_v7, 0.0  ;;  %v628_v41 = vmax.f32 %v564_v31, 0.0 }
 0x105   : > { %669 = vst [vmem:[%s1592_s20 + $0x118] sm:$0xff] %v605_v52  ;;  %v566_v52 = vmul.f32 %v1573_v58, %v1881_v37 }
 0x106   : > { %670 = vst [vmem:[%s1592_s20 + $0x120] sm:$0xff] %v606_v59  ;;  %v567_v59 = vmul.f32 %v1573_v58, %v1560_v6  ;;  %v629_v40 = vmax.f32 %v565_v15, 0.0 }
 0x107   : > { %671 = vst [vmem:[%s1592_s20 + $0x128] sm:$0xff] %v607_v3  ;;  %v568_v3 = vmul.f32 %v1573_v58, %v1565_v47  ;;  %v630_v6 = vmax.f32 %v566_v52, 0.0 }
 0x108   : > { %672 = vst [vmem:[%s1592_s20 + $0x130] sm:$0xff] %v608_v14  ;;  %v569_v14 = vmul.f32 %v1573_v58, %v1568_v26  ;;  %v631_v45 = vmax.f32 %v567_v59, 0.0 }
 0x109   : > { %673 = vst [vmem:[%s1592_s20 + $0x138] sm:$0xff] %v609_v22  ;;  %v632_v47 = vmax.f32 %v568_v3, 0.0 }
 0x10a   : > { %674 = vst [vmem:[%s1592_s20 + $0x140] sm:$0xff] %v610_v32  ;;  %v633_v22 = vmax.f32 %v569_v14, 0.0 }
 0x10b   : > { %675 = vst [vmem:[%s1592_s20 + $0x148] sm:$0xff] %v611_v42 }
 0x10c   : > { %676 = vst [vmem:[%s1592_s20 + $0x150] sm:$0xff] %v612_v51 }
 0x10d   : > { %677 = vst [vmem:[%s1592_s20 + $0x158] sm:$0xff] %v613_v62 }
 0x10e   : > { %678 = vst [vmem:[%s1592_s20 + $0x160] sm:$0xff] %v614_v1 }
 0x10f   : > { %679 = vst [vmem:[%s1592_s20 + $0x168] sm:$0xff] %v615_v43 }
 0x110   : > { %680 = vst [vmem:[%s1592_s20 + $0x170] sm:$0xff] %v616_v18 }
 0x111   : > { %681 = vst [vmem:[%s1592_s20 + $0x178] sm:$0xff] %v617_v0 }
 0x112   : > { %682 = vst [vmem:[%s1592_s20 + $0x180] sm:$0xff] %v618_v34 }
 0x113   : > { %683 = vst [vmem:[%s1592_s20 + $0x188] sm:$0xff] %v619_v9 }
 0x114   : > { %684 = vst [vmem:[%s1592_s20 + $0x190] sm:$0xff] %v620_v50 }
 0x115   : > { %685 = vst [vmem:[%s1592_s20 + $0x198] sm:$0xff] %v621_v17 }
 0x116   : > { %686 = vst [vmem:[%s1592_s20 + $0x1a0] sm:$0xff] %v622_v2 }
 0x117   : > { %687 = vst [vmem:[%s1592_s20 + $0x1a8] sm:$0xff] %v623_v29 }
 0x118   : > { %688 = vst [vmem:[%s1592_s20 + $0x1b0] sm:$0xff] %v624_v24 }
 0x119   : > { %689 = vst [vmem:[%s1592_s20 + $0x1b8] sm:$0xff] %v625_v33 }
 0x11a   : > { %690 = vst [vmem:[%s1592_s20 + $0x1c0] sm:$0xff] %v626_v46 }
 0x11b   : > { %691 = vst [vmem:[%s1592_s20 + $0x1c8] sm:$0xff] %v627_v36 }
 0x11c   : > { %692 = vst [vmem:[%s1592_s20 + $0x1d0] sm:$0xff] %v628_v41 }
 0x11d   : > { %693 = vst [vmem:[%s1592_s20 + $0x1d8] sm:$0xff] %v629_v40 }
 0x11e   : > { %694 = vst [vmem:[%s1592_s20 + $0x1e0] sm:$0xff] %v630_v6 }
 0x11f   : > { %695 = vst [vmem:[%s1592_s20 + $0x1e8] sm:$0xff] %v631_v45 }
 0x120   : > { %696 = vst [vmem:[%s1592_s20 + $0x1f0] sm:$0xff] %v632_v47 }
 0x121   : > { %697 = vst [vmem:[%s1592_s20 + $0x1f8] sm:$0xff] %v633_v22 }
 0x122   : > { %1028 = shalt.err (!%p1025_p11)
}
 0x123   : > { %s1108_s15 = smov 128   ;;  %s1109_s8 = smov 256  }
 0x124   : > { %s1110_s0 = smov 8  }
 0x125   : > { %852 = dma.vmem_to_hbm [thread:$0]  (%p1191_p9), %s713_s27, 8192, %s715_s4, %s699_s6, %s1108_s15, %s1109_s8, %s1110_s0  }
 0x126 PF: > { %p866_p13 = scmp.ge.s32.totalorder %s1103_s16, 2  ;;  %s729_s19 = sand.u32 1, %s1075_s9  }
 0x127   : > { %s730_s20 = scalar_lea.sflag [#allocation4], %s729_s19 }
 0x128   : > { %p862_p0 = pnand %p866_p13, %p1197_p12 }
 0x12a   : > { %p863_p1 = pneg %p862_p0 }
 0x12c   : > { %1070 = dma.done.wait (%p863_p1), %s730_s20, 8192  }
 0x12d   : > { %1072 = vsyncadd (%p863_p1), %s730_s20, 4294959104  ;;  %s21_s16 = sadd.s32 1, %s1103_s16   ;;  %s1882_s13 = sld [smem:[#allocation11_spill]] }
 0x12e   : > { %p18_p2 = scmp.ge.s32.totalorder %s21_s16, 6   ;;  %s1883_s25 = sld [smem:[#allocation12_spill]] }
 0x12f   : > { %s1884_s15 = sld [smem:[#allocation13_spill]]  ;;  %s1885_s9 = smov %s1079_s10 }
 0x130   : > { %s1886_s10 = smov %s1083_s11  ;;  %s1887_s11 = smov %s1206_s30 }
 0x131   : > { %s1888_s12 = smov %s1095_s14  ;;  %20 = sbr.rel (!%p18_p2) target bundleno = 11 (0xb), region = 86 }
 0x134   : > { %s1889_s14 = smov %s1883_s25 }
 0x136   :  { %736 = vsyncpa [#allocation3], 1 }
 0x137   :  { %738 = vsyncpa [#allocation3 + $0x1], 1 }
 0x138   :  { %739 = vsyncpa [#allocation6], 1 }
 0x139   :  { %741 = vsyncpa [#allocation6 + $0x1], 1 }
 0x13a   :  { %742 = vsyncpa [#allocation4], 1 }
 0x13b   :  { %744 = vsyncpa [#allocation4 + $0x1], 1 }

</bundles_post_ra>
